<compile_context>
chip_gen: v7x
topology: tpu7x:2x2x1
jax: 0.10.0
libtpu: 0.0.40
codegen_flags: <defaults>
</compile_context>

<pallas_src>
import functools

import jax
import jax.numpy as jnp
from jax.experimental import pallas as pl
from jax.experimental.pallas import tpu as pltpu

_MIB = 1024 * 1024


def _round_up(v, m):
    return ((v + m - 1) // m) * m


def _vmem_limit(est_bytes):
    # Generous headroom over the (already conservative) estimate; floor at
    # 16 MiB (<= every generation's default scoped limit), cap at 48 MiB so a
    # v7x TensorCore (64 MiB physical) keeps headroom for compiler scratch.
    return int(min(max(est_bytes * 3 // 2 + 4 * _MIB, 16 * _MIB), 48 * _MIB))


# --------------------------------------------------------------------------
# Prologue kernel: h = x @ W   (project-first path, used when Doutp <= Dinp)
# --------------------------------------------------------------------------
def _project_kernel(x_ref, w_ref, o_ref):
    o_ref[...] = jnp.dot(x_ref[...], w_ref[...],
                         preferred_element_type=jnp.float32).astype(o_ref.dtype)


def _project(x_p, w_p):
    """(B, Np, Dinp) bf16 @ (Dinp, Doutp) bf16 -> (B, Np, Doutp) bf16."""
    B, Np, Dinp = x_p.shape
    Doutp = w_p.shape[1]
    rows = B * Np                                   # multiple of 128
    tm = next(t for t in (512, 256, 128) if t <= rows and rows % t == 0)
    est = 2 * (tm * Dinp * 2 + Dinp * Doutp * 2 + tm * Doutp * 2)
    h = pl.pallas_call(
        _project_kernel,
        out_shape=jax.ShapeDtypeStruct((rows, Doutp), jnp.bfloat16),
        grid_spec=pltpu.PrefetchScalarGridSpec(
            num_scalar_prefetch=0,
            grid=(rows // tm,),
            in_specs=[
                pl.BlockSpec((tm, Dinp), lambda r: (r, 0)),
                pl.BlockSpec((Dinp, Doutp), lambda r: (0, 0)),  # fetched once
            ],
            out_specs=pl.BlockSpec((tm, Doutp), lambda r: (r, 0)),
        ),
        compiler_params=pltpu.CompilerParams(
            dimension_semantics=("parallel",),
            vmem_limit_bytes=_vmem_limit(est),
        ),
    )(x_p.reshape(rows, Dinp), w_p)
    return h.reshape(B, Np, Doutp)


# --------------------------------------------------------------------------
# Hot kernel: out = adj_self @ h  [@ W]  [+ b]  [L2-normalize]
# --------------------------------------------------------------------------
def _aggregate_kernel(*refs, project_epilogue, use_bias, normalize,
                      h_resident, tile_n):
    it = iter(refs)
    adj_ref = next(it)
    h_ref = next(it)
    w_ref = next(it) if project_epilogue else None
    b_ref = next(it) if use_bias else None
    o_ref = next(it)
    acc_ref = next(it)

    k = pl.program_id(2)
    nk = pl.num_programs(2)

    @pl.when(k == 0)
    def _():
        acc_ref[...] = jnp.zeros_like(acc_ref)

    if h_resident:
        # h is fully resident per batch group; grab the k-th row tile.
        off = pl.multiple_of(k * tile_n, tile_n)
        h = h_ref[:, pl.ds(off, tile_n), :]
    else:
        h = h_ref[...]

    # Aggregation partial product on the MXU: bf16 x bf16 -> f32 accumulator.
    acc_ref[...] += jnp.einsum("bij,bjd->bid", adj_ref[...], h,
                               preferred_element_type=jnp.float32)

    @pl.when(k == nk - 1)
    def _():
        out = acc_ref[...]
        if project_epilogue:
            # aggregate-first path: (adj_self @ x) @ W, once per row tile.
            out = jnp.einsum("bnd,de->bne", out.astype(w_ref.dtype), w_ref[...],
                             preferred_element_type=jnp.float32)
        if use_bias:
            out = out + b_ref[...].reshape((1, 1, -1))
        if normalize:
            # F.normalize(y, p=2, dim=2) == y * rsqrt(max(sum(y^2), 1e-24)).
            ss = jnp.sum(out * out, axis=-1, keepdims=True)
            out = out * jax.lax.rsqrt(jnp.maximum(ss, 1e-24))
        o_ref[...] = out.astype(o_ref.dtype)


def graph_conv(x, adj, weight, bias=None, *, add_self=True,
               normalize_embedding=False, max_tile_n=512):
    """Pallas TPU GraphConv forward.

    x:      (B, N, Din) f32;  adj: (B, N, N) f32 (0/1 adjacency expected);
    weight: (Din, Dout) f32;  bias: (Dout,) f32 or None.
    Returns (B, N, Dout) f32.
    """
    B, N, Din = x.shape
    Dout = weight.shape[1]
    use_bias = bias is not None

    Dinp = _round_up(Din, 128)
    Doutp = _round_up(Dout, 128)
    # Re-associate to adj @ (x @ W) whenever it does not widen the O(N^2)
    # matmul ((adj@x + x)@W == adj@(xW) + xW, so it is algebraically exact).
    project_first = Doutp <= Dinp
    Fh = Doutp if project_first else Dinp      # aggregated feature width

    # ---- adaptive node tile: biggest TN whose zero-padding overhead is small.
    np128 = _round_up(N, 128)
    TN = 128
    for cand in (1024, 512, 256, 128):
        if cand > max_tile_n or cand > np128:
            continue
        if _round_up(N, cand) - np128 <= max(N // 10, 0):
            TN = cand
            break
    Np = _round_up(N, TN)

    # ---- pack several small graphs per grid step (NB divides B, NB*Np<=512).
    NB = 1
    for d in range(min(B, max(1, 512 // Np)), 0, -1):
        if B % d == 0:
            NB = d
            break

    # ---- VMEM footprint estimate (counts double buffers); shrink TN to fit.
    def _estimate(tn, npad, nb, resident):
        est = 2 * nb * tn * tn * 2                      # adj tiles (bf16)
        est += (2 * nb * npad * Fh * 2 if resident      # resident h (worst: x2)
                else 2 * nb * tn * Fh * 2)              # streamed h tiles
        if not project_first:
            est += 2 * Dinp * Doutp * 2                 # W (bf16, epilogue)
        est += 2 * nb * tn * Doutp * 4                  # out tiles (f32)
        est += nb * tn * Fh * 4                         # accumulator scratch
        est += 2 * Doutp * 4                            # bias
        return est

    while True:
        h_resident = NB * Np * Fh * 2 <= 4 * _MIB
        est = _estimate(TN, Np, NB, h_resident)
        if est <= 40 * _MIB or TN == 128:
            break
        TN //= 2
        Np = _round_up(N, TN)

    # ---- pad / cast operands (TPU lane-dense shapes, bf16 MXU operands).
    adj_p = adj.astype(jnp.float32)
    if add_self:
        # Fold the self loop into the adjacency (values <= 2: exact in bf16).
        adj_p = adj_p + jnp.eye(N, dtype=jnp.float32)
    if Np != N:
        adj_p = jnp.pad(adj_p, ((0, 0), (0, Np - N), (0, Np - N)))
    adj_p = adj_p.astype(jnp.bfloat16)

    x_p = x.astype(jnp.bfloat16)
    if Np != N or Dinp != Din:
        x_p = jnp.pad(x_p, ((0, 0), (0, Np - N), (0, Dinp - Din)))

    w_p = weight.astype(jnp.bfloat16)
    if Dinp != Din or Doutp != Dout:
        w_p = jnp.pad(w_p, ((0, Dinp - Din), (0, Doutp - Dout)))

    if project_first:
        h_p = _project(x_p, w_p)        # (B, Np, Doutp) bf16
    else:
        h_p = x_p                       # aggregate first, project in epilogue

    operands = [adj_p, h_p]
    in_specs = [
        pl.BlockSpec((NB, TN, TN), lambda bb, i, k: (bb, i, k)),
    ]
    if h_resident:
        # Constant block index across (i, k): fetched once per batch group.
        in_specs.append(pl.BlockSpec((NB, Np, Fh), lambda bb, i, k: (bb, 0, 0)))
    else:
        in_specs.append(pl.BlockSpec((NB, TN, Fh), lambda bb, i, k: (bb, k, 0)))
    if not project_first:
        operands.append(w_p)
        in_specs.append(pl.BlockSpec((Dinp, Doutp), lambda bb, i, k: (0, 0)))
    if use_bias:
        b_p = bias.astype(jnp.float32)
        if Doutp != Dout:
            b_p = jnp.pad(b_p, (0, Doutp - Dout))
        operands.append(b_p.reshape(1, Doutp))
        in_specs.append(pl.BlockSpec((1, Doutp), lambda bb, i, k: (0, 0)))

    kernel = functools.partial(
        _aggregate_kernel,
        project_epilogue=not project_first,
        use_bias=use_bias,
        normalize=normalize_embedding,
        h_resident=h_resident,
        tile_n=TN,
    )

    out_p = pl.pallas_call(
        kernel,
        out_shape=jax.ShapeDtypeStruct((B, Np, Doutp), jnp.float32),
        grid_spec=pltpu.PrefetchScalarGridSpec(
            num_scalar_prefetch=0,
            grid=(B // NB, Np // TN, Np // TN),
            in_specs=in_specs,
            out_specs=pl.BlockSpec((NB, TN, Doutp), lambda bb, i, k: (bb, i, 0)),
            scratch_shapes=[pltpu.VMEM((NB, TN, Fh), jnp.float32)],
        ),
        compiler_params=pltpu.CompilerParams(
            dimension_semantics=("parallel", "parallel", "arbitrary"),
            vmem_limit_bytes=_vmem_limit(est),
        ),
    )(*operands)

    return out_p[:, :N, :Dout]


# --------------------------------------------------------------------------
# Reference + self-test
# --------------------------------------------------------------------------
def _reference(x, adj, weight, bias, add_self, normalize):
    y = jnp.einsum("bij,bjd->bid", adj, x)
    if add_self:
        y = y + x
    y = jnp.einsum("bnd,de->bne", y, weight)
    if bias is not None:
        y = y + bias
    if normalize:
        n = jnp.sqrt(jnp.sum(y * y, axis=2, keepdims=True))
        y = y / jnp.maximum(n, 1e-12)
    return y


if __name__ == "__main__":
    B, N = 2, 16
    input_dim, output_dim = 16, 32

    key = jax.random.PRNGKey(0)
    kx, ka, kw, kb, kw2, kb2 = jax.random.split(key, 6)

    x = jax.random.normal(kx, (B, N, input_dim), dtype=jnp.float32)
    adj = (jax.random.uniform(ka, (B, N, N), dtype=jnp.float32) > 0.5
           ).astype(jnp.float32)

    # Xavier-uniform weight (matching nn.init.xavier_uniform_), small bias so
    # the bias-add path is exercised.
    limit = (6.0 / (input_dim + output_dim)) ** 0.5
    weight = jax.random.uniform(kw, (input_dim, output_dim),
                                dtype=jnp.float32, minval=-limit, maxval=limit)
    bias = 0.1 * jax.random.normal(kb, (output_dim,), dtype=jnp.float32)

    def check(out, x_, w_, b_, add_self, norm):
        # The kernel intentionally rounds x / W to bf16 at its boundary; the
        # reference is evaluated at those same rounded inputs (in f32) so the
        # remaining error is just the in-kernel bf16 intermediates.
        xq = x_.astype(jnp.bfloat16).astype(jnp.float32)
        wq = w_.astype(jnp.bfloat16).astype(jnp.float32)
        ref = _reference(xq, adj, wq, b_, add_self, norm)
        assert out.shape == ref.shape, (out.shape, ref.shape)
        err = float(jnp.max(jnp.abs(out - ref)))
        assert jnp.allclose(out, ref, atol=3e-2, rtol=3e-2), err

    # Config 1: default GraphConv (add_self, bias, no normalization).
    # Doutp <= Dinp after padding -> project-first (adj @ (xW)) path.
    out = jax.block_until_ready(
        graph_conv(x, adj, weight, bias, add_self=True,
                   normalize_embedding=False))
    check(out, x, weight, bias, True, False)

    # Config 2: no self loop, no bias, L2-normalized embeddings.
    out2 = jax.block_until_ready(
        graph_conv(x, adj, weight, None, add_self=False,
                   normalize_embedding=True))
    check(out2, x, weight, None, False, True)

    # Config 3: Dout > Din after padding -> aggregate-first path with the
    # projection + bias + normalize folded into the last-k epilogue.
    wide_dim = 200
    limit2 = (6.0 / (input_dim + wide_dim)) ** 0.5
    weight2 = jax.random.uniform(kw2, (input_dim, wide_dim),
                                 dtype=jnp.float32, minval=-limit2,
                                 maxval=limit2)
    bias2 = 0.1 * jax.random.normal(kb2, (wide_dim,), dtype=jnp.float32)
    out3 = jax.block_until_ready(
        graph_conv(x, adj, weight2, bias2, add_self=True,
                   normalize_embedding=True))
    check(out3, x, weight2, bias2, True, True)

    print("KERNEL_OK")
</pallas_src>

<mosaic_0001>
module attributes {stable_mosaic.version = 11 : i64} {
  func.func @_project_kernel(%arg0: i32, %arg1: memref<256x128xbf16, #tpu.memory_space<vmem>>, %arg2: memref<128x128xbf16, #tpu.memory_space<vmem>>, %arg3: memref<256x128xbf16, #tpu.memory_space<vmem>>) attributes {dimension_semantics = [#tpu.dimension_semantics<parallel>], iteration_bounds = array<i64: 1>, scalar_prefetch = 0 : i64, scratch_operands = 0 : i64, tpu.core_type = #tpu.core_type<tc>, window_params = [{transform_indices = @transform_0, window_bounds = array<i64: 256, 128>}, {pipeline_mode = #tpu.pipeline_mode<synchronous>, transform_indices = @transform_1, window_bounds = array<i64: 128, 128>}, {transform_indices = @transform_2, window_bounds = array<i64: 256, 128>}]} {
    %c0 = arith.constant 0 : index
    %c0_0 = arith.constant 0 : index
    %0 = vector.load %arg1[%c0, %c0_0] : memref<256x128xbf16, #tpu.memory_space<vmem>>, vector<256x128xbf16>
    %c0_1 = arith.constant 0 : index
    %c0_2 = arith.constant 0 : index
    %1 = vector.load %arg2[%c0_1, %c0_2] : memref<128x128xbf16, #tpu.memory_space<vmem>>, vector<128x128xbf16>
    %cst = arith.constant dense<0.000000e+00> : vector<256x128xf32>
    %2 = tpu.matmul %0, %1, %cst {dimension_numbers = #tpu.dot_dimension_numbers<[1], [0], [0], [1], [0, 0, 1, 1], [], []>} : vector<256x128xbf16>, vector<128x128xbf16>, vector<256x128xf32> -> vector<256x128xf32>
    %3 = arith.truncf %2 : vector<256x128xf32> to vector<256x128xbf16>
    %c0_3 = arith.constant 0 : index
    %c0_4 = arith.constant 0 : index
    %4 = vector.load %arg3[%c0_3, %c0_4] : memref<256x128xbf16, #tpu.memory_space<vmem>>, vector<256x128xbf16>
    tpu.vector_store %arg3[%c0_3, %c0_4], %3 {strides = array<i32>} : memref<256x128xbf16, #tpu.memory_space<vmem>>, vector<256x128xbf16>,
    return
  }
  func.func @transform_0(%arg0: i32) -> (i32, i32) {
    %c0_i32 = arith.constant 0 : i32
    %c0_i32_0 = arith.constant 0 : i32
    return %arg0, %c0_i32 : i32, i32
  }
  func.func @transform_1(%arg0: i32) -> (i32, i32) {
    %c0_i32 = arith.constant 0 : i32
    %c0_i32_0 = arith.constant 0 : i32
    %c0_i32_1 = arith.constant 0 : i32
    return %c0_i32, %c0_i32_0 : i32, i32
  }
  func.func @transform_2(%arg0: i32) -> (i32, i32) {
    %c0_i32 = arith.constant 0 : i32
    %c0_i32_0 = arith.constant 0 : i32
    return %arg0, %c0_i32 : i32, i32
  }
}

</mosaic_0001>

<bundles_post_ra>
// kernel: tpu_custom_call.1
= control target key start
LH: loop header
LB: loop body
LE: loop exit
PB: predicated region body
PF: predicated region fallthrough
CT: control target
= control target key end

     0   :  { %7 = vsyncpa [#allocation3], 0  ;;  %s1009_s0 = inlined_call_operand.hbm [shape: bf16[256,128], index: 0, kind: input, shape index: {}]   ;;  %s1010_s1 = inlined_call_operand.hbm [shape: bf16[128,128], index: 1, kind: input, shape index: {}]   ;;  %s1011_s2 = inlined_call_operand.hbm [shape: bf16[256,128], index: 2, kind: output, shape index: {}]  }
   0x1   :  { %8 = vsyncpa [#allocation6], 0 }
   0x2   :  { %9 = vsyncpa [#allocation4], 0  ;;  %s944_s9 = smov [#allocation2]   ;;  %s872_s13 = scalar_lea.hbm %s1009_s0, 2048 }
   0x3   :  { %s15_s10 = sshll.u32 %s944_s9, 4  ;;  %p873_p0 = scmp.ne.s32.totalorder %s1009_s0, %s872_s13  ;;  %s16_s10 = int_to_ptr.vmem [resolvable:$true] %s15_s10 }
   0x4   :  { %p876_p1 = scmp.lt.u32.totalorder %s872_s13, %s1009_s0 }
   0x6   :  { %p878_p2 = pnand %p876_p1, %p873_p0 }
   0x8   :  { %881 = shalt.err (!%p878_p2)
}
   0x9   :  { %s882_s18 = scalar_lea.vmem %s16_s10, 2048  ;;  %p887_p4 = scmp.lt.s32.totalorder %s16_s10, %s16_s10 }
   0xa   :  { %p883_p3 = scmp.ne.s32.totalorder %s16_s10, %s882_s18  ;;  %p888_p5 = scmp.lt.s32.totalorder %s882_s18, %s882_s18 }
   0xc   :  { %p889_p6 = por %p888_p5, %p887_p4 }
   0xe   :  { %p890_p7 = pnand %p889_p6, %p883_p3 }
  0x10   :  { %893 = shalt.err (!%p890_p7)
}
  0x11   :  { %s945_s19 = smov 64   ;;  %s946_s20 = smov 4  }
  0x12   :  { %21 = dma.hbm_to_vmem [thread:$0]  %s1009_s0, 2048, %s16_s10, [#allocation3], %s945_s19, %s945_s19, %s946_s20  }
  0x13   :  { %s947_s23 = smov [#allocation5]   ;;  %s894_s27 = scalar_lea.hbm %s1010_s1, 1024 }
  0x14   :  { %s27_s24 = sshll.u32 %s947_s23, 4  ;;  %p895_p8 = scmp.ne.s32.totalorder %s1010_s1, %s894_s27  ;;  %s28_s24 = int_to_ptr.vmem [resolvable:$true] %s27_s24 }
  0x15   :  { %p898_p9 = scmp.lt.u32.totalorder %s894_s27, %s1010_s1 }
  0x17   :  { %p900_p10 = pnand %p898_p9, %p895_p8 }
  0x19   :  { %903 = shalt.err (!%p900_p10)
}
  0x1a   :  { %s904_s4 = scalar_lea.vmem %s28_s24, 1024  ;;  %p909_p12 = scmp.lt.s32.totalorder %s28_s24, %s28_s24 }
  0x1b   :  { %p905_p11 = scmp.ne.s32.totalorder %s28_s24, %s904_s4  ;;  %p910_p13 = scmp.lt.s32.totalorder %s904_s4, %s904_s4 }
  0x1d   :  { %p911_p0 = por %p910_p13, %p909_p12 }
  0x1f   :  { %p912_p1 = pnand %p911_p0, %p905_p11 }
  0x21   :  { %915 = shalt.err (!%p912_p1)
}
  0x22   :  { %33 = dma.hbm_to_vmem [thread:$0]  %s1010_s1, 1024, %s28_s24, [#allocation6], %s945_s19, %s945_s19, %s946_s20  }
  0x23   :  { %938 = dma.done.wait [#allocation3], 2048  }
  0x24   :  { %939 = vsyncadd [#allocation3], 4294965248 }
  0x25   :  { %940 = dma.done.wait [#allocation6], 1024  }
  0x26   :  { %941 = vsyncadd [#allocation6], 4294966272  ;;  %v848_v0 = vld [vmem:[#allocation5] sm:$0xff]   ;;  %v849_v1 = vld [vmem:[#allocation5 + $0x8] sm:$0xff]   ;;  %s948_s1 = smov [#allocation7]  }
  0x27   :  { %779 = vmatprep.subr.bf16.mxu0 %v848_v0  ;;  %827 = vmatprep.subr.bf16.mxu1 %v848_v0  ;;  %v850_v2 = vld [vmem:[#allocation5 + $0x10] sm:$0xff]   ;;  %v851_v3 = vld [vmem:[#allocation5 + $0x18] sm:$0xff]   ;;  %v856_v4 = vld [vmem:[#allocation2] sm:$0xff]   ;;  %s559_s6 = sshll.u32 %s948_s1, 4  ;;  %s560_s6 = int_to_ptr.vmem [resolvable:$true] %s559_s6 }
  0x28   :  { %780 = vmatpush3.bf16.msra.mxu0 %v848_v0  ;;  %835 = vmatpush3.bf16.msra.mxu1 %v848_v0  ;;  %v857_v5 = vld [vmem:[#allocation2 + $0x40] sm:$0xff]   ;;  %v853_v7 = vld [vmem:[#allocation5 + $0x28] sm:$0xff]   ;;  %v854_v8 = vld [vmem:[#allocation5 + $0x30] sm:$0xff]   ;;  %s916_s7 = scalar_lea.vmem %s560_s6, 2048  ;;  %p921_p3 = scmp.lt.s32.totalorder %s560_s6, %s560_s6 }
  0x29   :  { %781 = vmatprep.subr.bf16.mxu0 %v849_v1  ;;  %828 = vmatprep.subr.bf16.mxu1 %v849_v1  ;;  %v852_v6 = vld [vmem:[#allocation5 + $0x20] sm:$0xff]   ;;  %v855_v9 = vld [vmem:[#allocation5 + $0x38] sm:$0xff]   ;;  %v858_v10 = vld [vmem:[#allocation2 + $0x8] sm:$0xff]   ;;  %p917_p2 = scmp.ne.s32.totalorder %s560_s6, %s916_s7  ;;  %p922_p4 = scmp.lt.s32.totalorder %s916_s7, %s916_s7 }
  0x2a   :  { %795 = vmatprep.mubr.bf16.mxu0 %v856_v4  ;;  %811 = vmatprep.mubr.bf16.mxu1 %v857_v5  ;;  %v859_v11 = vld [vmem:[#allocation2 + $0x48] sm:$0xff]   ;;  %v860_v12 = vld [vmem:[#allocation2 + $0x10] sm:$0xff]   ;;  %v862_v14 = vld [vmem:[#allocation2 + $0x18] sm:$0xff]  }
  0x2b   :  { %v861_v13 = vld [vmem:[#allocation2 + $0x50] sm:$0xff]   ;;  %v863_v15 = vld [vmem:[#allocation2 + $0x58] sm:$0xff]   ;;  %v864_v16 = vld [vmem:[#allocation2 + $0x20] sm:$0xff]   ;;  %p923_p5 = por %p922_p4, %p921_p3 }
  0x2c   :  { %782 = vmatpush3.bf16.msra.mxu0 %v849_v1  ;;  %836 = vmatpush3.bf16.msra.mxu1 %v849_v1  ;;  %v865_v17 = vld [vmem:[#allocation2 + $0x60] sm:$0xff]   ;;  %v866_v18 = vld [vmem:[#allocation2 + $0x28] sm:$0xff]   ;;  %v868_v20 = vld [vmem:[#allocation2 + $0x30] sm:$0xff]  }
  0x2d   :  { %783 = vmatprep.subr.bf16.mxu0 %v850_v2  ;;  %829 = vmatprep.subr.bf16.mxu1 %v850_v2  ;;  %v867_v19 = vld [vmem:[#allocation2 + $0x68] sm:$0xff]   ;;  %v869_v21 = vld [vmem:[#allocation2 + $0x70] sm:$0xff]   ;;  %v870_v22 = vld [vmem:[#allocation2 + $0x38] sm:$0xff]   ;;  %p924_p6 = pnand %p923_p5, %p917_p2 }
  0x2e   :  { %v871_v23 = vld [vmem:[#allocation2 + $0x78] sm:$0xff]  }
  0x30   :  { %784 = vmatpush3.bf16.msra.mxu0 %v850_v2  ;;  %837 = vmatpush3.bf16.msra.mxu1 %v850_v2 }
  0x31   :  { %785 = vmatprep.subr.bf16.mxu0 %v851_v3  ;;  %830 = vmatprep.subr.bf16.mxu1 %v851_v3 }
  0x34   :  { %786 = vmatpush3.bf16.msra.mxu0 %v851_v3  ;;  %838 = vmatpush3.bf16.msra.mxu1 %v851_v3 }
  0x35   :  { %787 = vmatprep.subr.bf16.mxu0 %v852_v6  ;;  %831 = vmatprep.subr.bf16.mxu1 %v852_v6 }
  0x38   :  { %788 = vmatpush3.bf16.msra.mxu0 %v852_v6  ;;  %839 = vmatpush3.bf16.msra.mxu1 %v852_v6 }
  0x39   :  { %789 = vmatprep.subr.bf16.mxu0 %v853_v7  ;;  %832 = vmatprep.subr.bf16.mxu1 %v853_v7 }
  0x3c   :  { %790 = vmatpush3.bf16.msra.mxu0 %v853_v7  ;;  %840 = vmatpush3.bf16.msra.mxu1 %v853_v7 }
  0x3d   :  { %791 = vmatprep.subr.bf16.mxu0 %v854_v8  ;;  %833 = vmatprep.subr.bf16.mxu1 %v854_v8 }
  0x40   :  { %792 = vmatpush3.bf16.msra.mxu0 %v854_v8  ;;  %841 = vmatpush3.bf16.msra.mxu1 %v854_v8 }
  0x41   :  { %793 = vmatprep.subr.bf16.mxu0 %v855_v9  ;;  %834 = vmatprep.subr.bf16.mxu1 %v855_v9 }
  0x44   :  { %794 = vmatpush3.bf16.msra.mxu0 %v855_v9  ;;  %842 = vmatpush3.bf16.msra.mxu1 %v855_v9 }
  0x47   :  { %796 = vmatmul.mubr.bf16.vlgmr.msra.gmra.mrb[0].mxu0 %v858_v10  ;;  %812 = vmatmul.mubr.bf16.vlgmr.msra.gmra.mrb[0].mxu1 %v859_v11 }
  0x48   :  { %799 = vmatprep.mubr.bf16.mxu0 %v860_v12  ;;  %815 = vmatprep.mubr.bf16.mxu1 %v861_v13 }
  0x4f   :  { %800 = vmatmul.mubr.bf16.gmra.mrb[4].mxu0 %v862_v14  ;;  %816 = vmatmul.mubr.bf16.gmra.mrb[4].mxu1 %v863_v15 }
  0x50   :  { %803 = vmatprep.mubr.bf16.mxu0 %v864_v16  ;;  %819 = vmatprep.mubr.bf16.mxu1 %v865_v17 }
  0x57   :  { %804 = vmatmul.mubr.bf16.gmra.mrb[8].mxu0 %v866_v18  ;;  %820 = vmatmul.mubr.bf16.gmra.mrb[8].mxu1 %v867_v19 }
  0x58   :  { %807 = vmatprep.mubr.bf16.mxu0 %v868_v20  ;;  %823 = vmatprep.mubr.bf16.mxu1 %v869_v21 }
  0x5f   :  { %808 = vmatmul.mubr.bf16.gmra.mrb[12].mxu0 %v870_v22  ;;  %824 = vmatmul.mubr.bf16.gmra.mrb[12].mxu1 %v871_v23 }
 0x11a   :  { %v797_v24 = vpop.f32.mrb[0].mxu0  ;;  %v813_v25 = vpop.f32.mrb[0].mxu1 }
 0x11b   :  { %v267_v26 = vpop.f32.mrb[1].mxu0  ;;  %v331_v27 = vpop.f32.mrb[1].mxu1 }
 0x11c   :  { %v798_v28 = vpop.f32.mrb[2].mxu0  ;;  %v814_v29 = vpop.f32.mrb[2].mxu1 }
 0x11d   :  { %v668_v30 = vpack.c.bf16 %v798_v28, %v797_v24  ;;  %v708_v31 = vpack.c.bf16 %v814_v29, %v813_v25  ;;  %v270_v32 = vpop.f32.mrb[3].mxu0  ;;  %v334_v33 = vpop.f32.mrb[3].mxu1 }
 0x11e   :  { %v663_v34 = vpack.c.bf16 %v270_v32, %v267_v26  ;;  %v703_v35 = vpack.c.bf16 %v334_v33, %v331_v27 }
 0x11f   :  { %740 = vst [vmem:[#allocation7 + $0x8] sm:$0xff] %v668_v30   ;;  %748 = vst [vmem:[#allocation7 + $0x48] sm:$0xff] %v708_v31  }
 0x120   :  { %664 = vst [vmem:[#allocation7] sm:$0xff] %v663_v34   ;;  %747 = vst [vmem:[#allocation7 + $0x40] sm:$0xff] %v703_v35  }
 0x122   :  { %v801_v36 = vpop.f32.mrb[4].mxu0  ;;  %v817_v37 = vpop.f32.mrb[4].mxu1 }
 0x123   :  { %v283_v38 = vpop.f32.mrb[5].mxu0  ;;  %v347_v39 = vpop.f32.mrb[5].mxu1 }
 0x124   :  { %v802_v40 = vpop.f32.mrb[6].mxu0  ;;  %v818_v41 = vpop.f32.mrb[6].mxu1 }
 0x125   :  { %v678_v42 = vpack.c.bf16 %v802_v40, %v801_v36  ;;  %v718_v43 = vpack.c.bf16 %v818_v41, %v817_v37  ;;  %v286_v44 = vpop.f32.mrb[7].mxu0  ;;  %v350_v45 = vpop.f32.mrb[7].mxu1 }
 0x126   :  { %v673_v46 = vpack.c.bf16 %v286_v44, %v283_v38  ;;  %v713_v47 = vpack.c.bf16 %v350_v45, %v347_v39 }
 0x127   :  { %742 = vst [vmem:[#allocation7 + $0x18] sm:$0xff] %v678_v42   ;;  %750 = vst [vmem:[#allocation7 + $0x58] sm:$0xff] %v718_v43  }
 0x128   :  { %741 = vst [vmem:[#allocation7 + $0x10] sm:$0xff] %v673_v46   ;;  %749 = vst [vmem:[#allocation7 + $0x50] sm:$0xff] %v713_v47  }
 0x12a   :  { %v805_v48 = vpop.f32.mrb[8].mxu0  ;;  %v821_v49 = vpop.f32.mrb[8].mxu1 }
 0x12b   :  { %v299_v50 = vpop.f32.mrb[9].mxu0  ;;  %v363_v51 = vpop.f32.mrb[9].mxu1 }
 0x12c   :  { %v806_v52 = vpop.f32.mrb[10].mxu0  ;;  %v822_v53 = vpop.f32.mrb[10].mxu1 }
 0x12d   :  { %v688_v54 = vpack.c.bf16 %v806_v52, %v805_v48  ;;  %v728_v55 = vpack.c.bf16 %v822_v53, %v821_v49  ;;  %v302_v56 = vpop.f32.mrb[11].mxu0  ;;  %v366_v57 = vpop.f32.mrb[11].mxu1 }
 0x12e   :  { %v683_v58 = vpack.c.bf16 %v302_v56, %v299_v50  ;;  %v723_v59 = vpack.c.bf16 %v366_v57, %v363_v51 }
 0x12f   :  { %744 = vst [vmem:[#allocation7 + $0x28] sm:$0xff] %v688_v54   ;;  %752 = vst [vmem:[#allocation7 + $0x68] sm:$0xff] %v728_v55  }
 0x130   :  { %743 = vst [vmem:[#allocation7 + $0x20] sm:$0xff] %v683_v58   ;;  %751 = vst [vmem:[#allocation7 + $0x60] sm:$0xff] %v723_v59  }
 0x132   :  { %v809_v60 = vpop.f32.mrb[12].mxu0  ;;  %v825_v61 = vpop.f32.mrb[12].mxu1 }
 0x133   :  { %v315_v62 = vpop.f32.mrb[13].mxu0  ;;  %v379_v63 = vpop.f32.mrb[13].mxu1 }
 0x134   :  { %v810_v0 = vpop.f32.mrb[14].mxu0  ;;  %v826_v1 = vpop.f32.mrb[14].mxu1 }
 0x135   :  { %v698_v2 = vpack.c.bf16 %v810_v0, %v809_v60  ;;  %v738_v3 = vpack.c.bf16 %v826_v1, %v825_v61  ;;  %v318_v4 = vpop.f32.mrb[15].mxu0  ;;  %v382_v5 = vpop.f32.mrb[15].mxu1 }
 0x136   :  { %v693_v6 = vpack.c.bf16 %v318_v4, %v315_v62  ;;  %v733_v7 = vpack.c.bf16 %v382_v5, %v379_v63 }
 0x137   :  { %746 = vst [vmem:[#allocation7 + $0x38] sm:$0xff] %v698_v2   ;;  %754 = vst [vmem:[#allocation7 + $0x78] sm:$0xff] %v738_v3  }
 0x138   :  { %745 = vst [vmem:[#allocation7 + $0x30] sm:$0xff] %v693_v6   ;;  %753 = vst [vmem:[#allocation7 + $0x70] sm:$0xff] %v733_v7  }
 0x139   :  { %927 = shalt.err (!%p924_p6)
}
 0x13a   :  { %s928_s10 = scalar_lea.hbm %s1011_s2, 2048 }
 0x13b   :  { %p929_p7 = scmp.ne.s32.totalorder %s1011_s2, %s928_s10  ;;  %p932_p8 = scmp.lt.u32.totalorder %s928_s10, %s1011_s2 }
 0x13d   :  { %p934_p9 = pnand %p932_p8, %p929_p7 }
 0x13f   :  { %937 = shalt.err (!%p934_p9)
}
 0x140   :  { %565 = dma.vmem_to_hbm [thread:$0]  %s560_s6, 2048, %s1011_s2, [#allocation4], %s945_s19, %s945_s19, %s946_s20  }
 0x141   :  { %942 = dma.done.wait [#allocation4], 2048  }
 0x142   :  { %943 = vsyncadd [#allocation4], 4294965248 }
 0x143   :  { %569 = vsyncpa [#allocation3], 1 }
 0x144   :  { %570 = vsyncpa [#allocation6], 1 }
 0x145   :  { %571 = vsyncpa [#allocation4], 1 }

</bundles_post_ra>
